<compile_context>
chip_gen: v6e
topology: v6e:2x2x1
jax: 0.10.0
libtpu: 0.0.40
codegen_flags: <defaults>
</compile_context>

<pallas_src>
import functools
import math

import jax
import jax.numpy as jnp
from jax.experimental import pallas as pl
from jax.experimental.pallas import tpu as pltpu


def _self_attention_kernel(x_ref, w_ref, b_ref, ctx_ref, *probs_refs,
                           head_dim, mxu_dtype):
    """One (batch_block, head) grid cell of BERT-style self-attention."""
    bb, S, H = x_ref.shape
    T = bb * S
    Dh = head_dim

    # Token-major activations; MXU operands cast to mxu_dtype, accumulate f32.
    x = x_ref[...].reshape(T, H).astype(mxu_dtype)

    # Fused per-head QKV projection: ONE matmul + ONE bias add per grid step.
    # Weight columns were re-laid out head-major in the wrapper (trace time),
    # so q/k/v below are head-major by construction -- no staging scratch,
    # no in-kernel transpose, no per-head masked stores.
    w = w_ref[0]                                   # (H, 3*Dh), mxu_dtype
    bias = b_ref[0]                                # (1, 3*Dh), f32
    qkv = jnp.dot(x, w, preferred_element_type=jnp.float32) + bias   # (T, 3*Dh)

    q = qkv[:, :Dh].reshape(bb, S, Dh)
    k = qkv[:, Dh:2 * Dh].reshape(bb, S, Dh)
    v = qkv[:, 2 * Dh:].reshape(bb, S, Dh)

    # scores[b,i,j] = sum_d q[b,i,d] * k[b,j,d]; 1/sqrt(Dh) pre-folded into Wq/bq.
    scores = jax.lax.dot_general(
        q.astype(mxu_dtype), k.astype(mxu_dtype),
        (((2,), (2,)), ((0,), (0,))),
        preferred_element_type=jnp.float32)        # (bb, S, S) f32

    # Numerically-stable softmax in f32.  EUP approximate reciprocal + one
    # Newton refinement -> returned attention_probs rows sum to 1 while the
    # divide stays off the VALU.
    m = jnp.max(scores, axis=-1, keepdims=True)
    e = jnp.exp(scores - m)
    denom = jnp.sum(e, axis=-1, keepdims=True)
    r = pl.reciprocal(denom, approx=True)
    r = r * (2.0 - denom * r)
    p = e * r                                      # (bb, S, S)

    # TODO(synk): training-mode dropout on attention_probs (pltpu.prng_*);
    # eval-mode identity here (matches module.eval()).

    ctx = jax.lax.dot_general(
        p.astype(mxu_dtype), v.astype(mxu_dtype),
        (((2,), (1,)), ((0,), (0,))),
        preferred_element_type=jnp.float32)        # (bb, S, Dh)

    # Single dense full-block stores (no lane-narrow per-head slice stores).
    ctx_ref[...] = ctx[:, None].astype(ctx_ref.dtype)                 # (bb,1,S,Dh)
    if probs_refs:
        probs_refs[0][...] = p[:, None].astype(probs_refs[0].dtype)   # (bb,1,S,S)


def _pick_vmem_limit():
    """Per-generation VMEM limit (v5e/v6e: 128 MiB physical, v7x: 64 MiB)."""
    try:
        cap = pltpu.get_tpu_info().vmem_capacity_bytes
    except Exception:
        cap = 64 * 1024 * 1024
    return int(max(32 * 1024 * 1024, min(int(cap * 0.75), 100 * 1024 * 1024)))


def self_attention(hidden_states, wq, bq, wk, bk, wv, bv, *, num_heads,
                   batch_block=1, mxu_dtype=jnp.bfloat16,
                   output_attentions=True, probs_dtype=jnp.float32):
    """hidden_states: [B, S, H]; w*: [H, H] (y = x @ W + b); b*: [H]."""
    B, S, H = hidden_states.shape
    assert H % num_heads == 0
    assert B % batch_block == 0
    Dh = H // num_heads
    bb = batch_block

    # Trace-time weight prep (free): fold 1/sqrt(Dh) into the query projection,
    # relayout all three projections head-major and fuse them so each grid
    # step is one matmul + one bias add with head-major outputs.
    scale = 1.0 / math.sqrt(Dh)

    def heads_w(w):                       # (H, H) -> (NH, H, Dh)
        return jnp.transpose(w.reshape(H, num_heads, Dh), (1, 0, 2))

    def heads_b(b):                       # (H,) -> (NH, 1, Dh)
        return b.reshape(num_heads, 1, Dh)

    w_heads = jnp.concatenate(
        [heads_w(wq * scale), heads_w(wk), heads_w(wv)], axis=-1
    ).astype(mxu_dtype)                                     # (NH, H, 3*Dh)
    b_heads = jnp.concatenate(
        [heads_b(bq * scale), heads_b(bk), heads_b(bv)], axis=-1
    ).astype(jnp.float32)                                   # (NH, 1, 3*Dh)

    kernel = functools.partial(_self_attention_kernel,
                               head_dim=Dh, mxu_dtype=mxu_dtype)

    out_shape = [jax.ShapeDtypeStruct((B, num_heads, S, Dh), jnp.float32)]
    out_specs = [pl.BlockSpec((bb, 1, S, Dh), lambda b, h: (b, h, 0, 0))]
    if output_attentions:
        out_shape.append(jax.ShapeDtypeStruct((B, num_heads, S, S), probs_dtype))
        out_specs.append(pl.BlockSpec((bb, 1, S, S), lambda b, h: (b, h, 0, 0)))

    # Advisory cost for XLA's scheduler (projections + QK^T + PV, exp count,
    # HBM bytes including the probs writeback which dominates at large S).
    flops = 2 * B * S * H * (3 * H) + 4 * B * num_heads * S * S * Dh
    transcendentals = B * num_heads * S * S
    bytes_accessed = (
        B * S * H * hidden_states.dtype.itemsize
        + 3 * H * H * jnp.dtype(mxu_dtype).itemsize
        + 3 * H * 4
        + B * S * H * 4
        + (B * num_heads * S * S * jnp.dtype(probs_dtype).itemsize
           if output_attentions else 0))

    outs = pl.pallas_call(
        kernel,
        out_shape=tuple(out_shape),
        grid_spec=pltpu.PrefetchScalarGridSpec(
            num_scalar_prefetch=0,
            grid=(B // bb, num_heads),
            in_specs=[
                pl.BlockSpec((bb, S, H), lambda b, h: (b, 0, 0)),        # x
                pl.BlockSpec((1, H, 3 * Dh), lambda b, h: (h, 0, 0)),    # fused W
                pl.BlockSpec((1, 1, 3 * Dh), lambda b, h: (h, 0, 0)),    # fused b
            ],
            out_specs=tuple(out_specs),
        ),
        compiler_params=pltpu.CompilerParams(
            # Every (batch_block, head) cell is independent (no resident
            # accumulator blocks) -> both axes shard across TensorCores.
            dimension_semantics=("parallel", "parallel"),
            vmem_limit_bytes=_pick_vmem_limit(),
        ),
        cost_estimate=pl.CostEstimate(
            flops=flops, transcendentals=transcendentals,
            bytes_accessed=bytes_accessed),
    )(hidden_states, w_heads, b_heads)

    ctx_hm = outs[0]                               # (B, NH, S, Dh) head-major
    probs = outs[1] if output_attentions else None

    # Wrapper-side layout plumbing (cheap vs. probs traffic): head-major ->
    # (B, S, H), matching context_layer.permute(0, 2, 1, 3).view(B, S, H).
    ctx = jnp.transpose(ctx_hm, (0, 2, 1, 3)).reshape(B, S, H)
    return ctx, probs


def _reference(hidden_states, wq, bq, wk, bk, wv, bv, *, num_heads):
    """Pure-JAX reference mirroring the PyTorch forward exactly (eval mode)."""
    B, S, H = hidden_states.shape
    Dh = H // num_heads

    def proj(w, b):
        y = hidden_states @ w + b                      # (B, S, H)
        y = y.reshape(B, S, num_heads, Dh)
        return jnp.transpose(y, (0, 2, 1, 3))          # (B, nh, S, Dh)

    q = proj(wq, bq)
    k = proj(wk, bk)
    v = proj(wv, bv)
    scores = jnp.einsum("bhqd,bhkd->bhqk", q, k) / math.sqrt(Dh)
    probs = jax.nn.softmax(scores, axis=-1)
    ctx = jnp.einsum("bhqk,bhkd->bhqd", probs, v)      # (B, nh, S, Dh)
    ctx = jnp.transpose(ctx, (0, 2, 1, 3)).reshape(B, S, H)
    return ctx, probs


if __name__ == "__main__":
    # config: hidden_size=32, num_attention_heads=4, output_attentions=True
    B, S, HID, NH = 2, 8, 32, 4

    key = jax.random.PRNGKey(0)
    kx, kq, kk, kv, kbq, kbk, kbv = jax.random.split(key, 7)

    x = jax.random.normal(kx, (B, S, HID), dtype=jnp.float32)
    wq = 0.05 * jax.random.normal(kq, (HID, HID), dtype=jnp.float32)
    wk = 0.05 * jax.random.normal(kk, (HID, HID), dtype=jnp.float32)
    wv = 0.05 * jax.random.normal(kv, (HID, HID), dtype=jnp.float32)
    bq = 0.05 * jax.random.normal(kbq, (HID,), dtype=jnp.float32)
    bk = 0.05 * jax.random.normal(kbk, (HID,), dtype=jnp.float32)
    bv = 0.05 * jax.random.normal(kbv, (HID,), dtype=jnp.float32)

    ctx_want, probs_want = _reference(x, wq, bq, wk, bk, wv, bv, num_heads=NH)

    # 1) Default path: bf16 MXU operands, f32 accumulation + f32 softmax,
    #    grid = (B, NH) with both axes "parallel" (uses both v7x TensorCores).
    ctx1, probs1 = self_attention(x, wq, bq, wk, bk, wv, bv, num_heads=NH)
    jax.block_until_ready((ctx1, probs1))
    assert ctx1.shape == (B, S, HID)
    assert probs1.shape == (B, NH, S, S)
    assert jnp.allclose(ctx1, ctx_want, atol=2e-2, rtol=2e-2)
    assert jnp.allclose(probs1, probs_want, atol=2e-2, rtol=2e-2)

    # 2) f32 MXU operands: tight tolerance; returned attention_probs rows sum
    #    to 1 thanks to the Newton-refined reciprocal.
    ctx2, probs2 = self_attention(x, wq, bq, wk, bk, wv, bv, num_heads=NH,
                                  mxu_dtype=jnp.float32)
    jax.block_until_ready((ctx2, probs2))
    assert jnp.allclose(ctx2, ctx_want, atol=1e-4, rtol=1e-4)
    assert jnp.allclose(probs2, probs_want, atol=1e-4, rtol=1e-4)
    assert jnp.allclose(jnp.sum(probs2, axis=-1), 1.0, atol=1e-4)

    # 3) Whole batch per grid step + output_attentions=False (skips the probs
    #    HBM writeback entirely); exercises the bb > 1 code path.
    ctx3, probs3 = self_attention(x, wq, bq, wk, bk, wv, bv, num_heads=NH,
                                  batch_block=B, output_attentions=False)
    jax.block_until_ready(ctx3)
    assert probs3 is None
    assert jnp.allclose(ctx3, ctx_want, atol=2e-2, rtol=2e-2)

    print("KERNEL_OK")
</pallas_src>

<mosaic_0001>
module attributes {stable_mosaic.version = 11 : i64} {
  func.func @_self_attention_kernel(%arg0: i32, %arg1: i32, %arg2: memref<1x8x32xf32, #tpu.memory_space<vmem>>, %arg3: memref<1x32x24xbf16, #tpu.memory_space<vmem>>, %arg4: memref<1x1x24xf32, #tpu.memory_space<vmem>>, %arg5: memref<1x1x8x8xf32, #tpu.memory_space<vmem>>, %arg6: memref<1x1x8x8xf32, #tpu.memory_space<vmem>>) attributes {dimension_semantics = [#tpu.dimension_semantics<parallel>, #tpu.dimension_semantics<parallel>], iteration_bounds = array<i64: 2, 4>, scalar_prefetch = 0 : i64, scratch_operands = 0 : i64, tpu.core_type = #tpu.core_type<tc>, window_params = [{transform_indices = @transform_0, window_bounds = array<i64: 1, 8, 32>}, {transform_indices = @transform_1, window_bounds = array<i64: 1, 32, 24>}, {transform_indices = @transform_2, window_bounds = array<i64: 1, 1, 24>}, {transform_indices = @transform_3, window_bounds = array<i64: 1, 1, 8, 8>}, {transform_indices = @transform_4, window_bounds = array<i64: 1, 1, 8, 8>}]} {
    %c0 = arith.constant 0 : index
    %c0_0 = arith.constant 0 : index
    %c0_1 = arith.constant 0 : index
    %0 = vector.load %arg2[%c0, %c0_0, %c0_1] : memref<1x8x32xf32, #tpu.memory_space<vmem>>, vector<1x8x32xf32>
    %1 = vector.shape_cast %0 : vector<1x8x32xf32> to vector<8x32xf32>
    %2 = arith.truncf %1 : vector<8x32xf32> to vector<8x32xbf16>
    %c0_2 = arith.constant 0 : index
    %c0_3 = arith.constant 0 : index
    %c0_4 = arith.constant 0 : index
    %3 = vector.load %arg3[%c0_2, %c0_3, %c0_4] : memref<1x32x24xbf16, #tpu.memory_space<vmem>>, vector<1x32x24xbf16>
    %4 = vector.shape_cast %3 : vector<1x32x24xbf16> to vector<32x24xbf16>
    %c0_5 = arith.constant 0 : index
    %c0_6 = arith.constant 0 : index
    %c0_7 = arith.constant 0 : index
    %5 = vector.load %arg4[%c0_5, %c0_6, %c0_7] : memref<1x1x24xf32, #tpu.memory_space<vmem>>, vector<1x1x24xf32>
    %6 = vector.shape_cast %5 : vector<1x1x24xf32> to vector<1x24xf32>
    %cst = arith.constant dense<0.000000e+00> : vector<8x24xf32>
    %7 = tpu.matmul %2, %4, %cst {dimension_numbers = #tpu.dot_dimension_numbers<[1], [0], [0], [1], [0, 0, 1, 1], [], []>} : vector<8x32xbf16>, vector<32x24xbf16>, vector<8x24xf32> -> vector<8x24xf32>
    %8 = vector.broadcast %6 : vector<1x24xf32> to vector<8x24xf32>
    %9 = arith.addf %7, %8 : vector<8x24xf32>
    %10 = vector.extract_strided_slice %9 {offsets = [0, 0], sizes = [8, 8], strides = [1, 1]} : vector<8x24xf32> to vector<8x8xf32>
    %11 = vector.shape_cast %10 : vector<8x8xf32> to vector<1x8x8xf32>
    %12 = vector.extract_strided_slice %9 {offsets = [0, 8], sizes = [8, 8], strides = [1, 1]} : vector<8x24xf32> to vector<8x8xf32>
    %13 = vector.shape_cast %12 : vector<8x8xf32> to vector<1x8x8xf32>
    %14 = vector.extract_strided_slice %9 {offsets = [0, 16], sizes = [8, 8], strides = [1, 1]} : vector<8x24xf32> to vector<8x8xf32>
    %15 = vector.shape_cast %14 : vector<8x8xf32> to vector<1x8x8xf32>
    %16 = arith.truncf %11 : vector<1x8x8xf32> to vector<1x8x8xbf16>
    %17 = arith.truncf %13 : vector<1x8x8xf32> to vector<1x8x8xbf16>
    %cst_8 = arith.constant dense<0.000000e+00> : vector<1x8x8xf32>
    %18 = tpu.matmul %16, %17, %cst_8 {dimension_numbers = #tpu.dot_dimension_numbers<[2], [2], [1], [1], [0, 0, 0, 1, 1, 1], [0], [0]>} : vector<1x8x8xbf16>, vector<1x8x8xbf16>, vector<1x8x8xf32> -> vector<1x8x8xf32>
    %cst_9 = arith.constant dense<0xFF800000> : vector<1x8xf32>
    %19 = vector.multi_reduction <maximumf>, %18, %cst_9 [2] : vector<1x8x8xf32> to vector<1x8xf32>
    %20 = vector.shape_cast %19 : vector<1x8xf32> to vector<1x8x1xf32>
    %21 = vector.broadcast %20 : vector<1x8x1xf32> to vector<1x8x8xf32>
    %22 = arith.subf %18, %21 : vector<1x8x8xf32>
    %23 = math.exp %22 : vector<1x8x8xf32>
    %cst_10 = arith.constant dense<0.000000e+00> : vector<1x8xf32>
    %24 = vector.multi_reduction <add>, %23, %cst_10 [2] : vector<1x8x8xf32> to vector<1x8xf32>
    %25 = vector.shape_cast %24 : vector<1x8xf32> to vector<1x8x1xf32>
    %26 = tpu.reciprocal %25 {approx = true} : vector<1x8x1xf32> -> vector<1x8x1xf32>
    %27 = arith.mulf %25, %26 : vector<1x8x1xf32>
    %cst_11 = arith.constant 2.000000e+00 : f32
    %28 = vector.broadcast %cst_11 : f32 to vector<1x8x1xf32>
    %29 = arith.subf %28, %27 : vector<1x8x1xf32>
    %30 = arith.mulf %26, %29 : vector<1x8x1xf32>
    %31 = vector.broadcast %30 : vector<1x8x1xf32> to vector<1x8x8xf32>
    %32 = arith.mulf %23, %31 : vector<1x8x8xf32>
    %33 = arith.truncf %32 : vector<1x8x8xf32> to vector<1x8x8xbf16>
    %34 = arith.truncf %15 : vector<1x8x8xf32> to vector<1x8x8xbf16>
    %cst_12 = arith.constant dense<0.000000e+00> : vector<1x8x8xf32>
    %35 = tpu.matmul %33, %34, %cst_12 {dimension_numbers = #tpu.dot_dimension_numbers<[2], [1], [1], [2], [0, 0, 0, 1, 1, 2], [0], [0]>} : vector<1x8x8xbf16>, vector<1x8x8xbf16>, vector<1x8x8xf32> -> vector<1x8x8xf32>
    %36 = vector.shape_cast %35 : vector<1x8x8xf32> to vector<1x1x8x8xf32>
    %c0_13 = arith.constant 0 : index
    %c0_14 = arith.constant 0 : index
    %c0_15 = arith.constant 0 : index
    %c0_16 = arith.constant 0 : index
    %37 = vector.load %arg5[%c0_13, %c0_14, %c0_15, %c0_16] : memref<1x1x8x8xf32, #tpu.memory_space<vmem>>, vector<1x1x8x8xf32>
    tpu.vector_store %arg5[%c0_13, %c0_14, %c0_15, %c0_16], %36 {strides = array<i32>} : memref<1x1x8x8xf32, #tpu.memory_space<vmem>>, vector<1x1x8x8xf32>,
    %38 = vector.shape_cast %32 : vector<1x8x8xf32> to vector<1x1x8x8xf32>
    %c0_17 = arith.constant 0 : index
    %c0_18 = arith.constant 0 : index
    %c0_19 = arith.constant 0 : index
    %c0_20 = arith.constant 0 : index
    %39 = vector.load %arg6[%c0_17, %c0_18, %c0_19, %c0_20] : memref<1x1x8x8xf32, #tpu.memory_space<vmem>>, vector<1x1x8x8xf32>
    tpu.vector_store %arg6[%c0_17, %c0_18, %c0_19, %c0_20], %38 {strides = array<i32>} : memref<1x1x8x8xf32, #tpu.memory_space<vmem>>, vector<1x1x8x8xf32>,
    return
  }
  func.func @transform_0(%arg0: i32, %arg1: i32) -> (i32, i32, i32) {
    %c0_i32 = arith.constant 0 : i32
    %c0_i32_0 = arith.constant 0 : i32
    %c0_i32_1 = arith.constant 0 : i32
    return %arg0, %c0_i32, %c0_i32_0 : i32, i32, i32
  }
  func.func @transform_1(%arg0: i32, %arg1: i32) -> (i32, i32, i32) {
    %c0_i32 = arith.constant 0 : i32
    %c0_i32_0 = arith.constant 0 : i32
    %c0_i32_1 = arith.constant 0 : i32
    return %arg1, %c0_i32, %c0_i32_0 : i32, i32, i32
  }
  func.func @transform_2(%arg0: i32, %arg1: i32) -> (i32, i32, i32) {
    %c0_i32 = arith.constant 0 : i32
    %c0_i32_0 = arith.constant 0 : i32
    %c0_i32_1 = arith.constant 0 : i32
    return %arg1, %c0_i32, %c0_i32_0 : i32, i32, i32
  }
  func.func @transform_3(%arg0: i32, %arg1: i32) -> (i32, i32, i32, i32) {
    %c0_i32 = arith.constant 0 : i32
    %c0_i32_0 = arith.constant 0 : i32
    %c0_i32_1 = arith.constant 0 : i32
    return %arg0, %arg1, %c0_i32, %c0_i32_0 : i32, i32, i32, i32
  }
  func.func @transform_4(%arg0: i32, %arg1: i32) -> (i32, i32, i32, i32) {
    %c0_i32 = arith.constant 0 : i32
    %c0_i32_0 = arith.constant 0 : i32
    %c0_i32_1 = arith.constant 0 : i32
    return %arg0, %arg1, %c0_i32, %c0_i32_0 : i32, i32, i32, i32
  }
}

</mosaic_0001>

<bundles_post_ra>
// kernel: tpu_custom_call.1
= control target key start
LH: loop header
LB: loop body
LE: loop exit
PB: predicated region body
PF: predicated region fallthrough
CT: control target
= control target key end

     0   :  { %10 = vsyncpa [#allocation3], 0  ;;  %s1080_s0 = inlined_call_operand.vmem [shape: f32[2,8,32], index: 0, kind: input, shape index: {}]   ;;  %s1081_s1 = inlined_call_operand.vmem [shape: bf16[4,32,24], index: 1, kind: input, shape index: {}]   ;;  %s1082_s2 = inlined_call_operand.vmem [shape: f32[4,1,24], index: 2, kind: input, shape index: {}]   ;;  %s1083_s3 = inlined_call_operand.hbm [shape: f32[2,4,8,8], index: 3, kind: output, shape index: {0}]   ;;  %s1084_s4 = inlined_call_operand.hbm [shape: f32[2,4,8,8], index: 4, kind: output, shape index: {1}]  }
   0x1   :  { %12 = vsyncpa [#allocation3 + $0x1], 0 }
   0x2   :  { %13 = vsyncpa [#allocation5], 0 }
   0x3   :  { %15 = vsyncpa [#allocation5 + $0x1], 0  ;;  %s897_s15 = smov 0   ;;  %s899_s16 = smov 0  }
   0x4   :  { %s901_s17 = smov 0   ;;  %s903_s18 = smov 0  }
   0x5   :  { %s905_s19 = smov 0   ;;  %s907_s20 = smov 0  }
   0x6   :  { %s909_s21 = smov 0   ;;  %s911_s22 = smov 0  }
   0x7 LB: > { %s604_s23 = sadd.s32 4294967295, %s864_s22   ;;  %s605_s24 = sadd.s32 4294967294, %s864_s22   ;;  %s864_s22 = sphi %s911_s22, %s21_s22   ;;  %s860_s21 = sphi %s909_s21, %s1097_s21   ;;  %s856_s20 = sphi %s907_s20, %s1096_s20   ;;  %s852_s19 = sphi %s905_s19, %s1095_s19   ;;  %s848_s18 = sphi %s903_s18, %s1094_s18   ;;  %s844_s17 = sphi %s901_s17, %s1093_s17   ;;  %s840_s16 = sphi %s899_s16, %s1092_s16   ;;  %s836_s15 = sphi %s897_s15, %s1091_s15  }
   0x8   : > { %s30_s25 = sadd.s32 1, %s856_s20  ;;  %s33_s26 = sadd.s32 1, %s860_s21 }
   0x9   : > { %p31_p0 = scmp.ge.s32.totalorder %s30_s25, 4  ;;  %p130_p1 = scmp.ne.s32.totalorder %s844_s17, %s840_s16 }
   0xa   : > { %p131_p2 = scmp.eq.s32.totalorder %s604_s23, 7  ;;  %p136_p5 = scmp.ne.s32.totalorder %s840_s16, %s836_s15 }
   0xb   : > { %s1099_s25 = smov (%p31_p0, %s30_s25), 0  ;;  %s1101_s26 = smov (!%p31_p0, %s33_s26), %s860_s21 }
   0xc   : > { %s116_s27 = ssub.s32 %s856_s20, %s1099_s25  ;;  %p948_p3 = por %p131_p2, %p130_p1 }
   0xd   : > { %p35_p4 = scmp.ge.s32.totalorder %s1101_s26, 2  ;;  %p137_p6 = scmp.eq.s32.totalorder %s605_s24, 7 }
   0xe   : > { %p608_p7 = scmp.ge.s32.totalorder %s864_s22, 1  ;;  %p204_p9 = scmp.lt.s32.totalorder %s864_s22, 9 }
   0xf   : > { %s1103_s26 = smov (%p35_p4, %s1101_s26), 0  ;;  %p957_p8 = por %p137_p6, %p136_p5 }
  0x10   : > { %s115_s30 = ssub.s32 %s860_s21, %s1103_s26  ;;  %s120_s5 = sadd.s32 1, %s844_s17 }
  0x11   : > { %s117_s6 = sor.u32 %s116_s27, %s115_s30  ;;  %p205_p10 = pnand %p608_p7, %p204_p9 }
  0x12   : > { %p118_p11 = scmp.eq.s32.totalorder %s117_s6, 0  ;;  %p246_p12 = scmp.lt.s32.totalorder (!%p205_p10), %s848_s18, 3 }
  0x13   : > { %208 = sbr.rel (%p205_p10) target bundleno = 1078 (0x436), region = 32  ;;  %p242_p13 = scmp.lt.s32.totalorder (!%p205_p10), %s852_s19, 1 }
  0x14   : > { %s966_s7 = scalar_select %p118_p11, %s844_s17, %s120_s5  }
  0x18   : > { %v866_v0 = vmov 0.0   ;;  %vm867_vm0 = vmmov 0   ;;  %s247_s8 = scalar_select %p246_p12, %s848_s18, 3  ;;  %vm280_vm1 = vcmask 261120   ;;  %vm328_vm2 = vcmask 64512  }
  0x19   : > { %636 = vmatprep.subr.bf16.mxu0 %v866_v0  ;;  %640 = vmatprep.mubr.msk.bf16.mxu0 %vm867_vm0, %v866_v0  ;;  %s243_s9 = scalar_select %p242_p13, %s852_s19, 1  ;;  %vm395_vm3 = vcmask 1043456  }
  0x1a   : > { %644 = vmatprep.subr.bf16.mxu1 %v866_v0  ;;  %646 = vmatprep.mubr.msk.bf16.mxu1 %vm867_vm0, %v866_v0  ;;  %s628_s10 = sshll.u32 %s247_s8, 4  ;;  %s253_s6 = scalar_lea.vmem %s1082_s2, %s247_s8 }
  0x1b   : > { %s250_s13 = scalar_lea.vmem %s1081_s1, %s628_s10  ;;  %s611_s14 = sshll.u32 %s243_s9, 3  ;;  %v614_v5 = vld [vmem:[%s253_s6] ss:$0 sm:$0xff] }
  0x1c   : > { %v736_v1 = vld [vmem:[%s250_s13 + $0x8] sm:$0xff]   ;;  %s245_s27 = scalar_lea.vmem %s1080_s0, %s611_s14  ;;  %v737_v2 = vld [vmem:[%s250_s13] sm:$0xff]   ;;  %s868_s9 = smov 120  }
  0x1d   : > { %637 = vmatpush3.bf16.msra.mxu0 %v736_v1  ;;  %v255_v3 = vld [vmem:[%s245_s27] sm:$0xff]  ;;  %s869_s8 = smov 112   ;;  %s989_s10 = sand.u32 1, %s840_s16  }
  0x1e   : > { %638 = vmatprep.subr.bf16.mxu0 %v866_v0  ;;  %v256_v4 = vpack.c.bf16 %v255_v3, %v255_v3  ;;  %s1086_s11 = sshll.u32 %s989_s10, 3  ;;  %s622_s13 = sshll.u32 %s852_s19, 2 }
  0x1f   : > { %s241_s12 = scalar_lea.vmem [#allocation4], %s1086_s11  ;;  %s998_s14 = sadd.s32 %s848_s18, %s622_s13 }
  0x20   : > { %s1085_s23 = sshll.u32 %s998_s14, 7  ;;  %s477_s5 = sshll.u32 %s241_s12, 4  ;;  %s478_s5 = int_to_ptr.vmem [resolvable:$true] %s477_s5 }
  0x21   : > { %639 = vmatpush3.bf16.msra.mxu0 %v737_v2  ;;  %s475_s30 = scalar_lea.hbm %s1084_s4, %s1085_s23  ;;  %s447_s6 = scalar_lea.sflag [#allocation5], %s989_s10 }
  0x22   : > { %650 = vmatprep.subr.bf16.mxu0 %v866_v0 }
  0x24   : > { %641 = vmatmul.mubr.msk.bf16.vlgmr.msra.gmra.mxu0 %vm280_vm1, %v256_v4 }
  0x25   : > { %652 = vmatprep.mubr.msk.bf16.mxu0 %vm867_vm0, %v866_v0 }
  0xe4   : > { %v318_v6 = vpop.f32.mrf.mxu0 }
  0xe5   : > { %v319_v7 = vadd.f32 %v614_v5, %v318_v6 }
  0xe6   : > { %v642_v8 = vpop.f32.mrf.mxu0 }
  0xe7   : > { %v324_v9 = vpack.c.bf16 %v319_v7, %v319_v7 }
  0xe8   : > { %v321_v10 = vpop.f32.mrf.mxu0 }
  0xe9   : > { %326 = vrot.lane.b32.xlu0 %v324_v9, %s868_s9  ;;  %s742_s9 = scalar_lea.vmem %s478_s5, 128 }
  0xea   : > { %v643_v11 = vpop.f32.mrf.mxu0  ;;  %p743_p0 = scmp.ne.s32.totalorder %s478_s5, %s742_s9 }
  0xec   : > { %p744_p1 = pnand %p743_p0, %p948_p3 }
  0xee   : > { %p745_p2 = pneg %p744_p1 }
 0x15b   : > { %v327_v12 = vpop.permute.xlu0 %326 }
 0x15c   : > { %v333_v13 = vsel %vm328_vm2, %v327_v12, 0 }
 0x15d   : > { %645 = vmatpush3.bf16.xpose.msra.mxu1 %v333_v13 }
 0x164   : > { %647 = vmatmul.mubr.msk.bf16.vlgmr.msra.gmra.mxu1 %vm328_vm2, %v324_v9 }
 0x224   : > { %v369_v14 = vpop.f32.mrf.mxu1 }
 0x225   : > { %v375_v15 = vsel %vm328_vm2, %v369_v14, -inf }
 0x226   : > { %376 = vmax.xlane.f32.xlu0 %v375_v15  ;;  %v648_v16 = vpop.f32.mrf.mxu1 }
 0x228   : > { %v372_v17 = vpop.f32.mrf.mxu1 }
 0x22a   : > { %v649_v18 = vpop.f32.mrf.mxu1 }
 0x2af   : > { %v377_v19 = vpop.xlane.xlu0 %376 }
 0x2b0   : > { %v378_v20 = vsub.f32 %v369_v14, %v377_v19 }
 0x2b2   : > { %v379_v21 = vmul.f32 1.442695, %v378_v20 }
 0x2b4   : > { %738 = vpow2.f32 %v379_v21 }
 0x2c1   : > { %v739_v22 = vpop.eup %738 }
 0x2c2   : > { %v381_v23 = vsel %vm328_vm2, %v739_v22, 0.0 }
 0x2c3   : > { %382 = vadd.xlane.f32.xlu1 %v381_v23 }
 0x2d4   : > { %390 = vrot.lane.b32.xlu1 %v324_v9, %s869_s8  ;;  %s870_s8 = smov [#allocation4]  }
 0x2d5   : > { %s746_s19 = sshll.u32 %s870_s8, 4  ;;  %s747_s19 = int_to_ptr.vmem [resolvable:$false] %s746_s19 }
 0x2d6   : > { %s748_s18 = scalar_lea.vmem %s747_s19, 256  ;;  %p749_p4 = scmp.lt.s32.totalorder %s478_s5, %s747_s19 }
 0x2d7   : > { %p750_p5 = scmp.lt.s32.totalorder %s748_s18, %s742_s9 }
 0x2d9   : > { %p751_p6 = por %p750_p5, %p749_p4 }
 0x2db   : > { %p752_p7 = pnand %p751_p6, %p745_p2 }
 0x34c   : > { %v383_v24 = vpop.xlane.xlu1 %382 }
 0x34d   : > { %740 = vrcp.f32 %v383_v24 }
 0x350   : > { %v391_v25 = vpop.permute.xlu1 %390 }
 0x351   : > { %v397_v26 = vsel %vm395_vm3, %v391_v25, 0 }
 0x352   : > { %651 = vmatpush3.bf16.msra.mxu0 %v397_v26 }
 0x35a   : > { %v741_v27 = vpop.eup %740 }
 0x35b   : > { %v385_v28 = vmul.f32 %v741_v27, %v383_v24 }
 0x35d   : > { %v386_v29 = vsub.f32 2.0, %v385_v28 }
 0x35f   : > { %v387_v30 = vmul.f32 %v741_v27, %v386_v29 }
 0x361   : > { %v388_v31 = vmul.f32 %v739_v22, %v387_v30 }
 0x363   : > { %v389_v32 = vpack.c.bf16 %v388_v31, %v388_v31  ;;  %440 = vst.msk [vmem:[%s241_s12] sm:$0xff] %vm328_vm2, %v388_v31 }
 0x365   : > { %653 = vmatmul.mubr.msk.bf16.vlgmr.msra.gmra.mxu0 %vm328_vm2, %v389_v32 }
 0x366   : > { %755 = shalt.err (!%p752_p7)
}
 0x367   : > { %s756_s13 = scalar_lea.hbm %s475_s30, 128  ;;  %s760_s27 = scalar_lea.hbm %s1084_s4, 1024 }
 0x368   : > { %p757_p9 = scmp.ne.s32.totalorder %s475_s30, %s756_s13  ;;  %p761_p12 = scmp.lt.s32.totalorder %s475_s30, %s1084_s4 }
 0x369   : > { %p762_p13 = scmp.lt.s32.totalorder %s760_s27, %s756_s13 }
 0x36a   : > { %p758_p10 = pnand %p757_p9, %p948_p3 }
 0x36b   : > { %p763_p0 = por %p762_p13, %p761_p12 }
 0x36c   : > { %p759_p11 = pneg %p758_p10 }
 0x36e   : > { %p764_p1 = pnand %p763_p0, %p759_p11 }
 0x370   : > { %767 = shalt.err (!%p764_p1)
}
 0x371   : > { %657 = dma.vmem_to_hbm [thread:$0]  (%p948_p3), %s478_s5, 128, %s475_s30, %s447_s6  }
 0x372   : > { %s1089_s9 = sshll.u32 %s989_s10, 3  ;;  %s1090_s18 = sshll.u32 %s998_s14, 7 }
 0x373   : > { %s234_s8 = scalar_lea.vmem [#allocation2], %s1089_s9  ;;  %s1026_s11 = scalar_lea.hbm %s1083_s3, %s1090_s18 }
 0x374   : > { %s462_s19 = sshll.u32 %s234_s8, 4  ;;  %s442_s23 = scalar_lea.sflag [#allocation3], %s989_s10  ;;  %s1028_s19 = int_to_ptr.vmem [resolvable:$true] %s462_s19 }
 0x375   : > { %s768_s30 = scalar_lea.vmem %s1028_s19, 128  ;;  %s871_s14 = smov [#allocation2]  }
 0x376   : > { %p769_p2 = scmp.ne.s32.totalorder %s1028_s19, %s768_s30  ;;  %s772_s5 = sshll.u32 %s871_s14, 4  ;;  %s773_s5 = int_to_ptr.vmem [resolvable:$false] %s772_s5 }
 0x377   : > { %s774_s6 = scalar_lea.vmem %s773_s5, 256  ;;  %p775_p6 = scmp.lt.s32.totalorder %s1028_s19, %s773_s5 }
 0x378   : > { %p770_p4 = pnand %p769_p2, %p948_p3  ;;  %p776_p7 = scmp.lt.s32.totalorder %s774_s6, %s768_s30 }
 0x37a   : > { %p771_p5 = pneg %p770_p4  ;;  %p777_p9 = por %p776_p7, %p775_p6 }
 0x37c   : > { %p778_p10 = pnand %p777_p9, %p771_p5 }
 0x425   : > { %v433_v33 = vpop.f32.mrf.mxu0 }
 0x426   : > { %439 = vst.msk [vmem:[%s234_s8] sm:$0xff] %vm328_vm2, %v433_v33 }
 0x427   : > { %v654_v34 = vpop.f32.mrf.mxu0 }
 0x428   : > { %781 = shalt.err (!%p778_p10)
}
 0x429   : > { %s782_s13 = scalar_lea.hbm %s1026_s11, 128  ;;  %s786_s9 = scalar_lea.hbm %s1083_s3, 1024 }
 0x42a   : > { %p783_p11 = scmp.ne.s32.totalorder %s1026_s11, %s782_s13  ;;  %p787_p0 = scmp.lt.s32.totalorder %s1026_s11, %s1083_s3 }
 0x42b   : > { %p788_p1 = scmp.lt.s32.totalorder %s786_s9, %s782_s13 }
 0x42c   : > { %p784_p12 = pnand %p783_p11, %p948_p3 }
 0x42d   : > { %p789_p2 = por %p788_p1, %p787_p0 }
 0x42e   : > { %p785_p13 = pneg %p784_p12 }
 0x430   : > { %p790_p4 = pnand %p789_p2, %p785_p13 }
 0x432   : > { %793 = shalt.err (!%p790_p4)
}
 0x433   : > { %656 = dma.vmem_to_hbm [thread:$0]  (%p948_p3), %s1028_s19, 128, %s1026_s11, %s442_s23   ;;  %v436_v35 = vpop.f32.mrf.mxu0 }
 0x435   : > { %v655_v36 = vpop.f32.mrf.mxu0 }
 0x436 PF: > { %p667_p5 = scmp.ge.s32.totalorder %s864_s22, 2  ;;  %s489_s12 = sand.u32 1, %s836_s15  }
 0x437   : > { %s490_s24 = scalar_lea.sflag [#allocation3], %s489_s12 }
 0x438   : > { %p661_p6 = pnand %p667_p5, %p957_p8 }
 0x43a   : > { %p662_p7 = pneg %p661_p6 }
 0x43c   : > { %827 = dma.done.wait (%p662_p7), %s490_s24, 128  }
 0x43d   : > { %829 = vsyncadd (%p662_p7), %s490_s24, 4294967168  ;;  %s499_s30 = scalar_lea.sflag [#allocation5], %s489_s12 }
 0x43e   : > { %831 = dma.done.wait (%p662_p7), %s499_s30, 128  }
 0x43f   : > { %833 = vsyncadd (%p662_p7), %s499_s30, 4294967168  ;;  %s21_s22 = sadd.s32 1, %s864_s22   ;;  %s1091_s15 = smov %s840_s16 }
 0x440   : > { %p18_p3 = scmp.ge.s32.totalorder %s21_s22, 10   ;;  %s1092_s16 = smov %s844_s17 }
 0x441   : > { %s1093_s17 = smov %s966_s7  ;;  %s1094_s18 = smov %s856_s20 }
 0x442   : > { %s1095_s19 = smov %s860_s21  ;;  %s1096_s20 = smov %s1099_s25 }
 0x443   : > { %s1097_s21 = smov %s1103_s26  ;;  %20 = sbr.rel (!%p18_p3) target bundleno = 7 (0x7), region = 90 }
 0x448   :  { %504 = vsyncpa [#allocation3], 1 }
 0x449   :  { %506 = vsyncpa [#allocation3 + $0x1], 1 }
 0x44a   :  { %507 = vsyncpa [#allocation5], 1 }
 0x44b   :  { %509 = vsyncpa [#allocation5 + $0x1], 1 }

</bundles_post_ra>
